<compile_context>
chip_gen: v6e
topology: v6e:2x2x1
jax: 0.10.0
libtpu: 0.0.40
codegen_flags: <defaults>
</compile_context>

<pallas_src>
import functools

import jax
import jax.numpy as jnp
from jax import lax
from jax.experimental import pallas as pl
from jax.experimental.pallas import tpu as pltpu


# ---------------------------------------------------------------------------
# Fused kernel: one (batch, query-tile) grid step.
# ---------------------------------------------------------------------------
def _nonlocal_fused_kernel(x_ref, w_pg_ref, b_pg_ref, w_th_ref, b_th_ref,
                           w_w_ref, b_w_ref, z_ref, kker_scr, *, nkv, tq):
    """
    x_ref    : (1, N_pad, Cp) f32  full batch element; permuted token order:
                                   token = q*Nkv + m, q = 2*dh+dw (pool-window
                                   offset), m = pooled (t, hp, wp) position.
    w_pg_ref : (Cp, 2*ICp) bf16    [w_phi | w_g]          (zero padded)
    b_pg_ref : (1, 2*ICp)  f32     [b_phi | b_g]
    w_th_ref : (Cp, ICp)   bf16    w_theta / Nkv  (attention norm folded in)
    b_th_ref : (1, ICp)    f32     b_theta / Nkv
    w_w_ref  : (ICp, Cp)   bf16    w_W * bn_scale (BatchNorm folded in)
    b_w_ref  : (1, Cp)     f32     b_W * bn_scale + bn_shift
    z_ref    : (1, TQ, Cp) f32     output tile (same permuted token order)
    kker_scr : (ICp, ICp)  bf16    VMEM scratch: phi_pooled^T @ g_pooled
    """
    qt = pl.program_id(1)
    icp = kker_scr.shape[0]

    # ---- once per batch element: phi/g projection, (1,2,2) max-pool and the
    # ---- reassociated attention kernel  K = phi_p^T @ g_p  (ICp x ICp) -----
    # NOTE: relies on the q axis being sequential ("arbitrary") with qt==0
    # executed first for each b (scratch persists across the inner q loop).
    @pl.when(qt == 0)
    def _():
        w_pg = w_pg_ref[...]
        pooled = None
        for q in range(4):                       # 4 pool-window offsets
            blk = x_ref[0, pl.ds(q * nkv, nkv), :].astype(jnp.bfloat16)
            p = jnp.dot(blk, w_pg, preferred_element_type=jnp.float32)
            pooled = p if pooled is None else jnp.maximum(pooled, p)
        pooled = pooled + b_pg_ref[...]          # per-channel bias commutes
        phi_p = pooled[:, :icp].astype(jnp.bfloat16)        # (Nkv, ICp)
        g_p = pooled[:, icp:].astype(jnp.bfloat16)          # (Nkv, ICp)
        kker_scr[...] = lax.dot_general(
            phi_p, g_p, (((0,), (0,)), ((), ())),           # phi_p^T @ g_p
            preferred_element_type=jnp.float32).astype(jnp.bfloat16)

    # ---- every query tile: theta, y = theta @ K, W conv (+BN), residual ----
    q0 = pl.multiple_of(qt * tq, tq)
    x_t = x_ref[0, pl.ds(q0, tq), :]                               # (TQ, Cp)
    theta_t = jnp.dot(x_t.astype(jnp.bfloat16), w_th_ref[...],
                      preferred_element_type=jnp.float32) + b_th_ref[...]
    y = jnp.dot(theta_t.astype(jnp.bfloat16), kker_scr[...],
                preferred_element_type=jnp.float32)                # (TQ, ICp)
    w_y = jnp.dot(y.astype(jnp.bfloat16), w_w_ref[...],
                  preferred_element_type=jnp.float32) + b_w_ref[...]
    z_ref[0] = w_y + x_t


# ---------------------------------------------------------------------------
# Wrapper
# ---------------------------------------------------------------------------
def _round_up(v, m):
    return (v + m - 1) // m * m


def _tpu_tuning():
    """Return (query-tile size, scoped-VMEM limit bytes) per TPU generation."""
    try:
        kind = jax.devices()[0].device_kind.lower()
    except Exception:
        kind = ""
    if "v7" in kind or "tpu7" in kind:        # 256-wide MXU, 64 MiB VMEM
        return 256, 48 * 1024 * 1024
    if "v6" in kind or "tpu6" in kind:        # 256-wide MXU, 128 MiB VMEM
        return 256, 96 * 1024 * 1024
    if "v5" in kind or "v4" in kind:          # 128-wide MXUs, 128 MiB VMEM
        return 128, 96 * 1024 * 1024
    return 128, None                          # unknown: compiler default


def nonlocal_block_forward(x, params):
    """x: (B, C, T, H, W) float32 -> z: (B, C, T, H, W) float32."""
    B, C, T, H, W = x.shape
    IC = params["w_theta"].shape[1]
    assert H % 2 == 0 and W % 2 == 0, "MaxPool3d((1,2,2)) needs even H, W"
    Hp, Wp = H // 2, W // 2
    Nkv = T * Hp * Wp
    N = 4 * Nkv                               # == T * H * W

    Cp = _round_up(C, 128)                    # lane-dense channel padding
    ICp = _round_up(IC, 128)

    tq_pref, vmem_limit = _tpu_tuning()
    TQ = tq_pref if N >= tq_pref else _round_up(N, 8)
    N_pad = _round_up(N, TQ)

    # Single wrapper-side layout change: NCTHW -> channels-last, with the 2x2
    # pooling-window offsets hoisted to the front of the token axis so the
    # in-kernel pool is a max over 4 contiguous row blocks.
    xt = jnp.transpose(x, (0, 2, 3, 4, 1))                 # (B, T, H, W, C)
    xt = xt.reshape(B, T, Hp, 2, Wp, 2, C)                 # (B,T,Hp,dh,Wp,dw,C)
    x_perm = jnp.transpose(xt, (0, 3, 5, 1, 2, 4, 6)).reshape(B, N, C)
    x_perm = jnp.pad(x_perm, ((0, 0), (0, N_pad - N), (0, Cp - C)))

    def pad2(a, r, c):
        return jnp.pad(a, ((0, r - a.shape[0]), (0, c - a.shape[1])))

    # phi|g projection weights concatenated (one MXU weight push), bf16.
    w_pg = jnp.concatenate([pad2(params["w_phi"], Cp, ICp),
                            pad2(params["w_g"], Cp, ICp)],
                           axis=1).astype(jnp.bfloat16)
    b_pg = jnp.concatenate([pad2(params["b_phi"], 1, ICp),
                            pad2(params["b_g"], 1, ICp)], axis=1)

    # theta with the 1/Nkv attention normalisation folded in.
    w_th = (pad2(params["w_theta"], Cp, ICp) / Nkv).astype(jnp.bfloat16)
    b_th = pad2(params["b_theta"], 1, ICp) / Nkv

    # W (1x1x1 conv) with the inference-mode BatchNorm folded in.
    w_wf = pad2(params["w_W"] * params["bn_scale"], ICp, Cp).astype(jnp.bfloat16)
    b_wf = pad2(params["b_W"] * params["bn_scale"] + params["bn_shift"], 1, Cp)

    kernel = functools.partial(_nonlocal_fused_kernel, nkv=Nkv, tq=TQ)

    def invariant(shape):
        # Grid-invariant operand (weights / biases): full block, fixed index.
        return pl.BlockSpec(shape, lambda b, q: (0, 0))

    cp_kwargs = dict(dimension_semantics=("parallel", "arbitrary"))
    if vmem_limit is not None:
        cp_kwargs["vmem_limit_bytes"] = vmem_limit

    z_perm = pl.pallas_call(
        kernel,
        grid=(B, N_pad // TQ),
        in_specs=[
            # x: full batch element, resident in VMEM across all query tiles.
            pl.BlockSpec((1, N_pad, Cp), lambda b, q: (b, 0, 0)),
            invariant((Cp, 2 * ICp)), invariant((1, 2 * ICp)),
            invariant((Cp, ICp)), invariant((1, ICp)),
            invariant((ICp, Cp)), invariant((1, Cp)),
        ],
        out_specs=pl.BlockSpec((1, TQ, Cp), lambda b, q: (b, q, 0)),
        out_shape=jax.ShapeDtypeStruct((B, N_pad, Cp), jnp.float32),
        scratch_shapes=[pltpu.VMEM((ICp, ICp), jnp.bfloat16)],   # K = phi^T g
        compiler_params=pltpu.CompilerParams(**cp_kwargs),
    )(x_perm, w_pg, b_pg, w_th, b_th, w_wf, b_wf)

    # Crop padding, undo the token permutation: (B,dh,dw,T,Hp,Wp,C) -> NCTHW.
    z = z_perm[:, :N, :C].reshape(B, 2, 2, T, Hp, Wp, C)
    z = jnp.transpose(z, (0, 3, 4, 1, 5, 2, 6)).reshape(B, T, H, W, C)
    return jnp.transpose(z, (0, 4, 1, 2, 3))


# ---------------------------------------------------------------------------
# Deterministic parameter initialization (shapes from the module __init__).
# ---------------------------------------------------------------------------
def init_params(key, in_channels, inter_channels):
    C, IC = in_channels, inter_channels
    ks = jax.random.split(key, 8)

    def u(k, shape, scale=0.3):
        return scale * jax.random.uniform(k, shape, jnp.float32, -1.0, 1.0)

    params = dict(
        w_theta=u(ks[0], (C, IC)), b_theta=u(ks[1], (1, IC)),
        w_phi=u(ks[2], (C, IC)), b_phi=u(ks[3], (1, IC)),
        w_g=u(ks[4], (C, IC)), b_g=u(ks[5], (1, IC)),
        w_W=u(ks[6], (IC, C)), b_W=u(ks[7], (1, C)),
    )

    # BatchNorm3d (inference mode) folded into per-channel scale/shift.
    # NOTE: the PyTorch module initializes BN gamma = beta = 0, which makes
    # z == x trivially; we use deterministic NON-zero values here so the whole
    # compute path is exercised.
    gamma = jnp.linspace(0.5, 1.5, C, dtype=jnp.float32)
    beta = jnp.linspace(-0.1, 0.1, C, dtype=jnp.float32)
    running_mean = jnp.zeros((C,), jnp.float32)
    running_var = jnp.ones((C,), jnp.float32)
    eps = 1e-5
    scale = gamma / jnp.sqrt(running_var + eps)
    shift = beta - running_mean * scale
    params["bn_scale"] = scale.reshape(1, C)
    params["bn_shift"] = shift.reshape(1, C)
    return params


# ---------------------------------------------------------------------------
# Pure-JAX f32 reference (mirrors the PyTorch forward exactly).
# ---------------------------------------------------------------------------
def reference_forward(x, p):
    B, C, T, H, W = x.shape
    IC = p["w_theta"].shape[1]
    Hp, Wp = H // 2, W // 2
    xt = jnp.transpose(x, (0, 2, 3, 4, 1))                       # (B,T,H,W,C)

    theta = jnp.einsum("bthwc,ci->bthwi", xt, p["w_theta"]) + p["b_theta"][0]
    phi = jnp.einsum("bthwc,ci->bthwi", xt, p["w_phi"]) + p["b_phi"][0]
    g = jnp.einsum("bthwc,ci->bthwi", xt, p["w_g"]) + p["b_g"][0]

    def pool(a):
        return a.reshape(B, T, Hp, 2, Wp, 2, IC).max(axis=(3, 5)).reshape(B, -1, IC)

    theta_f = theta.reshape(B, -1, IC)
    phi_p = pool(phi)
    g_p = pool(g)
    n_kv = phi_p.shape[1]

    f = jnp.einsum("bni,bmi->bnm", theta_f, phi_p) / n_kv
    y = jnp.einsum("bnm,bmi->bni", f, g_p)
    w_y = jnp.einsum("bni,ic->bnc", y, p["w_W"]) + p["b_W"][0]
    w_y = w_y * p["bn_scale"][0] + p["bn_shift"][0]
    z = w_y + xt.reshape(B, -1, C)
    return jnp.transpose(z.reshape(B, T, H, W, C), (0, 4, 1, 2, 3))


if __name__ == "__main__":
    B, C, T, H, W = 2, 4, 4, 8, 8          # in_channels=4 -> inter_channels=2
    IC = C // 2

    key = jax.random.PRNGKey(0)
    kx, kp = jax.random.split(key)
    x = jax.random.normal(kx, (B, C, T, H, W), dtype=jnp.float32)
    params = init_params(kp, C, IC)

    z = jax.jit(nonlocal_block_forward)(x, params)
    z = jax.block_until_ready(z)

    z_ref = reference_forward(x, params)
    assert z.shape == (B, C, T, H, W)
    err = float(jnp.max(jnp.abs(z - z_ref)))
    # bf16 MXU inputs (f32 accumulation) vs a pure-f32 reference -> loose tol.
    assert jnp.allclose(z, z_ref, atol=2e-2, rtol=2e-2), f"max abs err = {err}"

    print("KERNEL_OK")
</pallas_src>

<mosaic_0001>
module attributes {stable_mosaic.version = 11 : i64} {
  func.func @_nonlocal_fused_kernel(%arg0: i32, %arg1: i32, %arg2: memref<1x256x128xf32, #tpu.memory_space<vmem>>, %arg3: memref<128x256xbf16, #tpu.memory_space<vmem>>, %arg4: memref<1x256xf32, #tpu.memory_space<vmem>>, %arg5: memref<128x128xbf16, #tpu.memory_space<vmem>>, %arg6: memref<1x128xf32, #tpu.memory_space<vmem>>, %arg7: memref<128x128xbf16, #tpu.memory_space<vmem>>, %arg8: memref<1x128xf32, #tpu.memory_space<vmem>>, %arg9: memref<1x128x128xf32, #tpu.memory_space<vmem>>, %arg10: memref<128x128xbf16, #tpu.memory_space<vmem>>) attributes {dimension_semantics = [#tpu.dimension_semantics<parallel>, #tpu.dimension_semantics<arbitrary>], iteration_bounds = array<i64: 2, 2>, scalar_prefetch = 0 : i64, scratch_operands = 1 : i64, tpu.core_type = #tpu.core_type<tc>, window_params = [{transform_indices = @transform_0, window_bounds = array<i64: 1, 256, 128>}, {pipeline_mode = #tpu.pipeline_mode<synchronous>, transform_indices = @transform_1, window_bounds = array<i64: 128, 256>}, {pipeline_mode = #tpu.pipeline_mode<synchronous>, transform_indices = @transform_2, window_bounds = array<i64: 1, 256>}, {pipeline_mode = #tpu.pipeline_mode<synchronous>, transform_indices = @transform_3, window_bounds = array<i64: 128, 128>}, {pipeline_mode = #tpu.pipeline_mode<synchronous>, transform_indices = @transform_4, window_bounds = array<i64: 1, 128>}, {pipeline_mode = #tpu.pipeline_mode<synchronous>, transform_indices = @transform_5, window_bounds = array<i64: 128, 128>}, {pipeline_mode = #tpu.pipeline_mode<synchronous>, transform_indices = @transform_6, window_bounds = array<i64: 1, 128>}, {transform_indices = @transform_7, window_bounds = array<i64: 1, 128, 128>}]} {
    %c0_i32 = arith.constant 0 : i32
    %0 = arith.cmpi eq, %arg1, %c0_i32 : i32
    %1 = arith.extui %0 : i1 to i32
    %c0_i32_0 = arith.constant 0 : i32
    %2 = arith.cmpi ne, %1, %c0_i32_0 : i32
    scf.if %2 {
      %c0_17 = arith.constant 0 : index
      %c0_18 = arith.constant 0 : index
      %27 = vector.load %arg3[%c0_17, %c0_18] : memref<128x256xbf16, #tpu.memory_space<vmem>>, vector<128x256xbf16>
      %c0_19 = arith.constant 0 : index
      %c0_20 = arith.constant 0 : index
      %c0_21 = arith.constant 0 : index
      %28 = vector.load %arg2[%c0_19, %c0_20, %c0_21] : memref<1x256x128xf32, #tpu.memory_space<vmem>>, vector<1x64x128xf32>
      %29 = vector.shape_cast %28 : vector<1x64x128xf32> to vector<64x128xf32>
      %30 = arith.truncf %29 : vector<64x128xf32> to vector<64x128xbf16>
      %cst_22 = arith.constant dense<0.000000e+00> : vector<64x256xf32>
      %31 = tpu.matmul %30, %27, %cst_22 {dimension_numbers = #tpu.dot_dimension_numbers<[1], [0], [0], [1], [0, 0, 1, 1], [], []>} : vector<64x128xbf16>, vector<128x256xbf16>, vector<64x256xf32> -> vector<64x256xf32>
      %c0_23 = arith.constant 0 : index
      %c64 = arith.constant 64 : index
      %c0_24 = arith.constant 0 : index
      %32 = vector.load %arg2[%c0_23, %c64, %c0_24] : memref<1x256x128xf32, #tpu.memory_space<vmem>>, vector<1x64x128xf32>
      %33 = vector.shape_cast %32 : vector<1x64x128xf32> to vector<64x128xf32>
      %34 = arith.truncf %33 : vector<64x128xf32> to vector<64x128xbf16>
      %cst_25 = arith.constant dense<0.000000e+00> : vector<64x256xf32>
      %35 = tpu.matmul %34, %27, %cst_25 {dimension_numbers = #tpu.dot_dimension_numbers<[1], [0], [0], [1], [0, 0, 1, 1], [], []>} : vector<64x128xbf16>, vector<128x256xbf16>, vector<64x256xf32> -> vector<64x256xf32>
      %36 = arith.maximumf %31, %35 : vector<64x256xf32>
      %c0_26 = arith.constant 0 : index
      %c128 = arith.constant 128 : index
      %c0_27 = arith.constant 0 : index
      %37 = vector.load %arg2[%c0_26, %c128, %c0_27] : memref<1x256x128xf32, #tpu.memory_space<vmem>>, vector<1x64x128xf32>
      %38 = vector.shape_cast %37 : vector<1x64x128xf32> to vector<64x128xf32>
      %39 = arith.truncf %38 : vector<64x128xf32> to vector<64x128xbf16>
      %cst_28 = arith.constant dense<0.000000e+00> : vector<64x256xf32>
      %40 = tpu.matmul %39, %27, %cst_28 {dimension_numbers = #tpu.dot_dimension_numbers<[1], [0], [0], [1], [0, 0, 1, 1], [], []>} : vector<64x128xbf16>, vector<128x256xbf16>, vector<64x256xf32> -> vector<64x256xf32>
      %41 = arith.maximumf %36, %40 : vector<64x256xf32>
      %c0_29 = arith.constant 0 : index
      %c192 = arith.constant 192 : index
      %c0_30 = arith.constant 0 : index
      %42 = vector.load %arg2[%c0_29, %c192, %c0_30] : memref<1x256x128xf32, #tpu.memory_space<vmem>>, vector<1x64x128xf32>
      %43 = vector.shape_cast %42 : vector<1x64x128xf32> to vector<64x128xf32>
      %44 = arith.truncf %43 : vector<64x128xf32> to vector<64x128xbf16>
      %cst_31 = arith.constant dense<0.000000e+00> : vector<64x256xf32>
      %45 = tpu.matmul %44, %27, %cst_31 {dimension_numbers = #tpu.dot_dimension_numbers<[1], [0], [0], [1], [0, 0, 1, 1], [], []>} : vector<64x128xbf16>, vector<128x256xbf16>, vector<64x256xf32> -> vector<64x256xf32>
      %46 = arith.maximumf %41, %45 : vector<64x256xf32>
      %c0_32 = arith.constant 0 : index
      %c0_33 = arith.constant 0 : index
      %47 = vector.load %arg4[%c0_32, %c0_33] : memref<1x256xf32, #tpu.memory_space<vmem>>, vector<1x256xf32>
      %48 = vector.broadcast %47 : vector<1x256xf32> to vector<64x256xf32>
      %49 = arith.addf %46, %48 : vector<64x256xf32>
      %50 = vector.extract_strided_slice %49 {offsets = [0, 0], sizes = [64, 128], strides = [1, 1]} : vector<64x256xf32> to vector<64x128xf32>
      %51 = arith.truncf %50 : vector<64x128xf32> to vector<64x128xbf16>
      %52 = vector.extract_strided_slice %49 {offsets = [0, 128], sizes = [64, 128], strides = [1, 1]} : vector<64x256xf32> to vector<64x128xf32>
      %53 = arith.truncf %52 : vector<64x128xf32> to vector<64x128xbf16>
      %cst_34 = arith.constant dense<0.000000e+00> : vector<128x128xf32>
      %54 = tpu.matmul %51, %53, %cst_34 {dimension_numbers = #tpu.dot_dimension_numbers<[0], [0], [1], [1], [0, 1, 1, 1], [], []>} : vector<64x128xbf16>, vector<64x128xbf16>, vector<128x128xf32> -> vector<128x128xf32>
      %55 = arith.truncf %54 : vector<128x128xf32> to vector<128x128xbf16>
      %c0_35 = arith.constant 0 : index
      %c0_36 = arith.constant 0 : index
      %56 = vector.load %arg10[%c0_35, %c0_36] : memref<128x128xbf16, #tpu.memory_space<vmem>>, vector<128x128xbf16>
      tpu.vector_store %arg10[%c0_35, %c0_36], %55 {strides = array<i32>} : memref<128x128xbf16, #tpu.memory_space<vmem>>, vector<128x128xbf16>,
    } else {
    }
    %c128_i32 = arith.constant 128 : i32
    %3 = arith.muli %arg1, %c128_i32 : i32
    %4 = tpu.assume_multiple %3, 128 : i32
    %c0 = arith.constant 0 : index
    %5 = arith.index_cast %4 : i32 to index
    %c0_1 = arith.constant 0 : index
    %6 = vector.load %arg2[%c0, %5, %c0_1] : memref<1x256x128xf32, #tpu.memory_space<vmem>>, vector<1x128x128xf32>
    %7 = vector.shape_cast %6 : vector<1x128x128xf32> to vector<128x128xf32>
    %8 = arith.truncf %7 : vector<128x128xf32> to vector<128x128xbf16>
    %c0_2 = arith.constant 0 : index
    %c0_3 = arith.constant 0 : index
    %9 = vector.load %arg5[%c0_2, %c0_3] : memref<128x128xbf16, #tpu.memory_space<vmem>>, vector<128x128xbf16>
    %cst = arith.constant dense<0.000000e+00> : vector<128x128xf32>
    %10 = tpu.matmul %8, %9, %cst {dimension_numbers = #tpu.dot_dimension_numbers<[1], [0], [0], [1], [0, 0, 1, 1], [], []>} : vector<128x128xbf16>, vector<128x128xbf16>, vector<128x128xf32> -> vector<128x128xf32>
    %c0_4 = arith.constant 0 : index
    %c0_5 = arith.constant 0 : index
    %11 = vector.load %arg6[%c0_4, %c0_5] : memref<1x128xf32, #tpu.memory_space<vmem>>, vector<1x128xf32>
    %12 = vector.broadcast %11 : vector<1x128xf32> to vector<128x128xf32>
    %13 = arith.addf %10, %12 : vector<128x128xf32>
    %14 = arith.truncf %13 : vector<128x128xf32> to vector<128x128xbf16>
    %c0_6 = arith.constant 0 : index
    %c0_7 = arith.constant 0 : index
    %15 = vector.load %arg10[%c0_6, %c0_7] : memref<128x128xbf16, #tpu.memory_space<vmem>>, vector<128x128xbf16>
    %cst_8 = arith.constant dense<0.000000e+00> : vector<128x128xf32>
    %16 = tpu.matmul %14, %15, %cst_8 {dimension_numbers = #tpu.dot_dimension_numbers<[1], [0], [0], [1], [0, 0, 1, 1], [], []>} : vector<128x128xbf16>, vector<128x128xbf16>, vector<128x128xf32> -> vector<128x128xf32>
    %17 = arith.truncf %16 : vector<128x128xf32> to vector<128x128xbf16>
    %c0_9 = arith.constant 0 : index
    %c0_10 = arith.constant 0 : index
    %18 = vector.load %arg7[%c0_9, %c0_10] : memref<128x128xbf16, #tpu.memory_space<vmem>>, vector<128x128xbf16>
    %cst_11 = arith.constant dense<0.000000e+00> : vector<128x128xf32>
    %19 = tpu.matmul %17, %18, %cst_11 {dimension_numbers = #tpu.dot_dimension_numbers<[1], [0], [0], [1], [0, 0, 1, 1], [], []>} : vector<128x128xbf16>, vector<128x128xbf16>, vector<128x128xf32> -> vector<128x128xf32>
    %c0_12 = arith.constant 0 : index
    %c0_13 = arith.constant 0 : index
    %20 = vector.load %arg8[%c0_12, %c0_13] : memref<1x128xf32, #tpu.memory_space<vmem>>, vector<1x128xf32>
    %21 = vector.broadcast %20 : vector<1x128xf32> to vector<128x128xf32>
    %22 = arith.addf %19, %21 : vector<128x128xf32>
    %23 = arith.addf %22, %7 : vector<128x128xf32>
    %c0_14 = arith.constant 0 : index
    %c0_15 = arith.constant 0 : index
    %c0_16 = arith.constant 0 : index
    %24 = vector.load %arg9[%c0_14, %c0_15, %c0_16] : memref<1x128x128xf32, #tpu.memory_space<vmem>>, vector<1x128x128xf32>
    %25 = vector.shape_cast %24 : vector<1x128x128xf32> to vector<128x128xf32>
    %26 = vector.shape_cast %23 : vector<128x128xf32> to vector<1x128x128xf32>
    tpu.vector_store %arg9[%c0_14, %c0_15, %c0_16], %26 {strides = array<i32>} : memref<1x128x128xf32, #tpu.memory_space<vmem>>, vector<1x128x128xf32>,
    return
  }
  func.func @transform_0(%arg0: i32, %arg1: i32) -> (i32, i32, i32) {
    %c0_i32 = arith.constant 0 : i32
    %c0_i32_0 = arith.constant 0 : i32
    %c0_i32_1 = arith.constant 0 : i32
    return %arg0, %c0_i32, %c0_i32_0 : i32, i32, i32
  }
  func.func @transform_1(%arg0: i32, %arg1: i32) -> (i32, i32) {
    %c0_i32 = arith.constant 0 : i32
    %c0_i32_0 = arith.constant 0 : i32
    %c0_i32_1 = arith.constant 0 : i32
    return %c0_i32, %c0_i32_0 : i32, i32
  }
  func.func @transform_2(%arg0: i32, %arg1: i32) -> (i32, i32) {
    %c0_i32 = arith.constant 0 : i32
    %c0_i32_0 = arith.constant 0 : i32
    %c0_i32_1 = arith.constant 0 : i32
    return %c0_i32, %c0_i32_0 : i32, i32
  }
  func.func @transform_3(%arg0: i32, %arg1: i32) -> (i32, i32) {
    %c0_i32 = arith.constant 0 : i32
    %c0_i32_0 = arith.constant 0 : i32
    %c0_i32_1 = arith.constant 0 : i32
    return %c0_i32, %c0_i32_0 : i32, i32
  }
  func.func @transform_4(%arg0: i32, %arg1: i32) -> (i32, i32) {
    %c0_i32 = arith.constant 0 : i32
    %c0_i32_0 = arith.constant 0 : i32
    %c0_i32_1 = arith.constant 0 : i32
    return %c0_i32, %c0_i32_0 : i32, i32
  }
  func.func @transform_5(%arg0: i32, %arg1: i32) -> (i32, i32) {
    %c0_i32 = arith.constant 0 : i32
    %c0_i32_0 = arith.constant 0 : i32
    %c0_i32_1 = arith.constant 0 : i32
    return %c0_i32, %c0_i32_0 : i32, i32
  }
  func.func @transform_6(%arg0: i32, %arg1: i32) -> (i32, i32) {
    %c0_i32 = arith.constant 0 : i32
    %c0_i32_0 = arith.constant 0 : i32
    %c0_i32_1 = arith.constant 0 : i32
    return %c0_i32, %c0_i32_0 : i32, i32
  }
  func.func @transform_7(%arg0: i32, %arg1: i32) -> (i32, i32, i32) {
    %c0_i32 = arith.constant 0 : i32
    %c0_i32_0 = arith.constant 0 : i32
    return %arg0, %arg1, %c0_i32 : i32, i32, i32
  }
}

</mosaic_0001>

<bundles_post_ra>
// kernel: nonlocal_block_forward.1
= control target key start
LH: loop header
LB: loop body
LE: loop exit
PB: predicated region body
PF: predicated region fallthrough
CT: control target
= control target key end

     0   :  { %s2220_s24 = smov 0   ;;  %s2222_s25 = smov 0   ;;  %s2710_s0 = inlined_call_operand.vmem [shape: f32[2,256,128], index: 0, kind: input, shape index: {}]   ;;  %s2711_s1 = inlined_call_operand.vmem [shape: bf16[128,256], index: 1, kind: input, shape index: {}]   ;;  %s2712_s2 = inlined_call_operand.vmem [shape: f32[1,256], index: 2, kind: input, shape index: {}]   ;;  %s2713_s3 = inlined_call_operand.vmem [shape: bf16[128,128], index: 3, kind: input, shape index: {}]   ;;  %s2714_s4 = inlined_call_operand.vmem [shape: f32[1,128], index: 4, kind: input, shape index: {}]   ;;  %s2715_s5 = inlined_call_operand.vmem [shape: bf16[128,128], index: 5, kind: input, shape index: {}]   ;;  %s2716_s6 = inlined_call_operand.vmem [shape: f32[1,128], index: 6, kind: input, shape index: {}]   ;;  %s2717_s7 = inlined_call_operand.vmem [shape: f32[2,256,128], index: 7, kind: output, shape index: {}]  }
   0x1   :  { %s2224_s26 = smov 0   ;;  %s2226_s27 = smov 0  }
   0x2   :  { %s2228_s28 = smov 0  }
   0x3 LB: > { %s26_s29 = sadd.s32 1, %s2169_s26  ;;  %s29_s30 = sadd.s32 1, %s2173_s27  ;;  %s2177_s28 = sphi %s2228_s28, %s17_s28   ;;  %s2173_s27 = sphi %s2226_s27, %s2721_s27   ;;  %s2169_s26 = sphi %s2224_s26, %s2720_s26   ;;  %s2165_s25 = sphi %s2222_s25, %s2719_s25   ;;  %s2161_s24 = sphi %s2220_s24, %s2718_s24  }
   0x4   : > { %p27_p0 = scmp.ge.s32.totalorder %s26_s29, 2  ;;  %p1706_p1 = scmp.ge.s32.totalorder %s2177_s28, 1 }
   0x5   : > { %p251_p2 = scmp.lt.s32.totalorder %s2177_s28, 5 }
   0x6   : > { %s2723_s29 = smov (%p27_p0, %s26_s29), 0  ;;  %s2725_s30 = smov (!%p27_p0, %s29_s30), %s2173_s27 }
   0x7   : > { %p252_p3 = pnand %p1706_p1, %p251_p2  ;;  %p31_p4 = scmp.ge.s32.totalorder %s2725_s30, 2 }
   0x8   : > { %p287_p5 = scmp.lt.s32.totalorder (!%p252_p3), %s2165_s25, 1  ;;  %s1709_s8 = sshll.u32 (!%p252_p3), %s2161_s24, 4 }
   0x9   : > { %s2727_s30 = smov (%p31_p4, %s2725_s30), 0  ;;  %255 = sbr.rel (%p252_p3) target bundleno = 1301 (0x515), region = 48 }
   0xa   : > { %p295_p6 = scmp.lt.s32.totalorder (!%p252_p3), %s1709_s8, 31  ;;  %p1712_p7 = scmp.ne.s32.totalorder (!%p252_p3), %s2161_s24, 0 }
   0xe   : > { %s2729_s25 = smov (!%p287_p5, %s2165_s25), 1  ;;  %s2731_s8 = smov (!%p295_p6, %s1709_s8), 31 }
   0xf   : > { %s1782_s9 = sshll.u32 %s2729_s25, 8  ;;  %s1710_s10 = sshll.u32 %s2729_s25, 5 }
  0x10   : > { %s2256_s13 = scalar_lea.vmem %s2710_s0, %s1782_s9  ;;  %s298_s14 = sadd.s32 %s1710_s10, %s2731_s8 }
  0x11   : > { %s1711_s15 = sshll.u32 %s298_s14, 3  ;;  %306 = sbr.rel (%p1712_p7) target bundleno = 634 (0x27a), region = 52 }
  0x12   : > { %s2261_s18 = scalar_lea.vmem %s2717_s7, %s1711_s15 }
  0x16   : > { %v2091_v0 = vld [vmem:[%s2711_s1 + $0x74] ss:$8 sps:$4 sm:$0xff]   ;;  %v2093_v1 = vld [vmem:[%s2711_s1 + $0x70] ss:$8 sps:$4 sm:$0xff]   ;;  %v2179_v2 = vmov 0   ;;  %v323_v17 = vld [vmem:[%s2256_s13] sm:$0xff] }
  0x17   : > { %447 = vmatprep.mubr.bf16.mxu0 %v2179_v2  ;;  %532 = vmatprep.mubr.bf16.mxu1 %v2179_v2  ;;  %v2094_v3 = vld [vmem:[%s2711_s1 + $0x64] ss:$8 sps:$4 sm:$0xff]   ;;  %v2278_v4 = vld [vmem:[%s2711_s1 + $0x60] ss:$8 sps:$4 sm:$0xff]   ;;  %v2097_v5 = vld [vmem:[%s2711_s1 + $0x54] ss:$8 sps:$4 sm:$0xff]  }
  0x18   : > { %415 = vmatprep.subr.bf16.mxu0 %v2091_v0  ;;  %500 = vmatprep.subr.bf16.mxu1 %v2091_v0  ;;  %v2288_v6 = vld [vmem:[%s2711_s1 + $0x50] ss:$8 sps:$4 sm:$0xff]   ;;  %v2293_v7 = vld [vmem:[%s2711_s1 + $0x44] ss:$8 sps:$4 sm:$0xff]   ;;  %v2300_v8 = vld [vmem:[%s2711_s1 + $0x40] ss:$8 sps:$4 sm:$0xff]  }
  0x19   : > { %416 = vmatpush1.bf16.msra.mxu0 %v2093_v1  ;;  %501 = vmatpush1.bf16.msra.mxu1 %v2093_v1  ;;  %v2307_v9 = vld [vmem:[%s2711_s1 + $0x34] ss:$8 sps:$4 sm:$0xff]   ;;  %v2314_v10 = vld [vmem:[%s2711_s1 + $0x30] ss:$8 sps:$4 sm:$0xff]   ;;  %v2321_v11 = vld [vmem:[%s2711_s1 + $0x24] ss:$8 sps:$4 sm:$0xff]  }
  0x1a   : > { %417 = vmatprep.subr.bf16.mxu0 %v2094_v3  ;;  %502 = vmatprep.subr.bf16.mxu1 %v2094_v3  ;;  %v2328_v12 = vld [vmem:[%s2711_s1 + $0x20] ss:$8 sps:$4 sm:$0xff]   ;;  %v2335_v13 = vld [vmem:[%s2711_s1 + $0x14] ss:$8 sps:$4 sm:$0xff]   ;;  %v2342_v14 = vld [vmem:[%s2711_s1 + $0x10] ss:$8 sps:$4 sm:$0xff]  }
  0x1b   : > { %v2349_v15 = vld [vmem:[%s2711_s1 + $0x4] ss:$8 sps:$4 sm:$0xff]   ;;  %v2354_v16 = vld [vmem:[%s2711_s1] ss:$8 sps:$4 sm:$0xff]   ;;  %v325_v23 = vld [vmem:[%s2256_s13 + $0x10] sm:$0xff]  ;;  %vm843_vm0 = vcmask 523264  }
  0x1c   : > { %v324_v18 = vld [vmem:[%s2256_s13 + $0x8] sm:$0xff]  ;;  %v488_v19 = vld [vmem:[%s2256_s13 + $0x40] sm:$0xff]  ;;  %v326_v24 = vld [vmem:[%s2256_s13 + $0x18] sm:$0xff] }
  0x1d   : > { %418 = vmatpush1.bf16.msra.mxu0 %v2278_v4  ;;  %503 = vmatpush1.bf16.msra.mxu1 %v2278_v4  ;;  %v489_v20 = vld [vmem:[%s2256_s13 + $0x48] sm:$0xff]  ;;  %v331_v21 = vpack.c.bf16 %v324_v18, %v323_v17  ;;  %v490_v25 = vld [vmem:[%s2256_s13 + $0x50] sm:$0xff]  ;;  %v491_v26 = vld [vmem:[%s2256_s13 + $0x58] sm:$0xff]  ;;  %v332_v27 = vpack.c.bf16 %v326_v24, %v325_v23 }
  0x1e   : > { %419 = vmatprep.subr.bf16.mxu0 %v2097_v5  ;;  %504 = vmatprep.subr.bf16.mxu1 %v2097_v5  ;;  %v496_v22 = vpack.c.bf16 %v489_v20, %v488_v19  ;;  %v497_v28 = vpack.c.bf16 %v491_v26, %v490_v25  ;;  %v327_v29 = vld [vmem:[%s2256_s13 + $0x20] sm:$0xff]  ;;  %v328_v30 = vld [vmem:[%s2256_s13 + $0x28] sm:$0xff]  ;;  %v329_v35 = vld [vmem:[%s2256_s13 + $0x30] sm:$0xff] }
  0x1f   : > { %v492_v31 = vld [vmem:[%s2256_s13 + $0x60] sm:$0xff]  ;;  %v493_v32 = vld [vmem:[%s2256_s13 + $0x68] sm:$0xff]  ;;  %v333_v33 = vpack.c.bf16 %v328_v30, %v327_v29  ;;  %v330_v36 = vld [vmem:[%s2256_s13 + $0x38] sm:$0xff] }
  0x20   : > { %v498_v34 = vpack.c.bf16 %v493_v32, %v492_v31  ;;  %v494_v37 = vld [vmem:[%s2256_s13 + $0x70] sm:$0xff]  ;;  %v495_v38 = vld [vmem:[%s2256_s13 + $0x78] sm:$0xff]  ;;  %v334_v39 = vpack.c.bf16 %v330_v36, %v329_v35  ;;  %v589_v41 = vld [vmem:[%s2256_s13 + $0x80] sm:$0xff] }
  0x21   : > { %420 = vmatpush1.bf16.msra.mxu0 %v2288_v6  ;;  %505 = vmatpush1.bf16.msra.mxu1 %v2288_v6  ;;  %v499_v40 = vpack.c.bf16 %v495_v38, %v494_v37  ;;  %v590_v42 = vld [vmem:[%s2256_s13 + $0x88] sm:$0xff]  ;;  %v690_v43 = vld [vmem:[%s2256_s13 + $0xc0] sm:$0xff]  ;;  %v591_v47 = vld [vmem:[%s2256_s13 + $0x90] sm:$0xff] }
  0x22   : > { %421 = vmatprep.subr.bf16.mxu0 %v2293_v7  ;;  %506 = vmatprep.subr.bf16.mxu1 %v2293_v7  ;;  %v691_v44 = vld [vmem:[%s2256_s13 + $0xc8] sm:$0xff]  ;;  %v597_v45 = vpack.c.bf16 %v590_v42, %v589_v41  ;;  %v592_v48 = vld [vmem:[%s2256_s13 + $0x98] sm:$0xff]  ;;  %v692_v49 = vld [vmem:[%s2256_s13 + $0xd0] sm:$0xff] }
  0x23   : > { %v698_v46 = vpack.c.bf16 %v691_v44, %v690_v43  ;;  %v693_v50 = vld [vmem:[%s2256_s13 + $0xd8] sm:$0xff]  ;;  %v598_v51 = vpack.c.bf16 %v592_v48, %v591_v47  ;;  %v593_v53 = vld [vmem:[%s2256_s13 + $0xa0] sm:$0xff]  ;;  %v594_v54 = vld [vmem:[%s2256_s13 + $0xa8] sm:$0xff] }
  0x24   : > { %v699_v52 = vpack.c.bf16 %v693_v50, %v692_v49  ;;  %v694_v55 = vld [vmem:[%s2256_s13 + $0xe0] sm:$0xff]  ;;  %v695_v56 = vld [vmem:[%s2256_s13 + $0xe8] sm:$0xff]  ;;  %v599_v57 = vpack.c.bf16 %v594_v54, %v593_v53  ;;  %v595_v59 = vld [vmem:[%s2256_s13 + $0xb0] sm:$0xff] }
  0x25   : > { %422 = vmatpush1.bf16.msra.mxu0 %v2300_v8  ;;  %507 = vmatpush1.bf16.msra.mxu1 %v2300_v8  ;;  %v700_v58 = vpack.c.bf16 %v695_v56, %v694_v55  ;;  %v596_v60 = vld [vmem:[%s2256_s13 + $0xb8] sm:$0xff]  ;;  %v696_v61 = vld [vmem:[%s2256_s13 + $0xf0] sm:$0xff]  ;;  %v791_v43 = vld [vmem:[%s2712_s2] sm:$0x3] }
  0x26   : > { %423 = vmatprep.subr.bf16.mxu0 %v2307_v9  ;;  %508 = vmatprep.subr.bf16.mxu1 %v2307_v9  ;;  %v697_v62 = vld [vmem:[%s2256_s13 + $0xf8] sm:$0xff]  ;;  %v600_v63 = vpack.c.bf16 %v596_v60, %v595_v59 }
  0x29   : > { %424 = vmatpush1.bf16.msra.mxu0 %v2314_v10  ;;  %509 = vmatpush1.bf16.msra.mxu1 %v2314_v10 }
  0x2a   : > { %425 = vmatprep.subr.bf16.mxu0 %v2321_v11  ;;  %510 = vmatprep.subr.bf16.mxu1 %v2321_v11 }
  0x2d   : > { %426 = vmatpush1.bf16.msra.mxu0 %v2328_v12  ;;  %511 = vmatpush1.bf16.msra.mxu1 %v2328_v12 }
  0x2e   : > { %427 = vmatprep.subr.bf16.mxu0 %v2335_v13  ;;  %512 = vmatprep.subr.bf16.mxu1 %v2335_v13 }
  0x31   : > { %428 = vmatpush1.bf16.msra.mxu0 %v2342_v14  ;;  %513 = vmatpush1.bf16.msra.mxu1 %v2342_v14 }
  0x32   : > { %429 = vmatprep.subr.bf16.mxu0 %v2349_v15  ;;  %514 = vmatprep.subr.bf16.mxu1 %v2349_v15 }
  0x35   : > { %430 = vmatpush1.bf16.msra.mxu0 %v2354_v16  ;;  %515 = vmatpush1.bf16.msra.mxu1 %v2354_v16 }
  0x36   : > { %601 = vmatprep.subr.bf16.mxu0 %v2091_v0  ;;  %702 = vmatprep.subr.bf16.mxu1 %v2091_v0  ;;  %v701_v0 = vpack.c.bf16 %v697_v62, %v696_v61 }
  0x38   : > { %448 = vmatmul.mubr.bf16.vlgmr.msra.gmra.mxu0 %v331_v21  ;;  %533 = vmatmul.mubr.bf16.vlgmr.msra.gmra.mxu1 %v496_v22 }
  0x39   : > { %602 = vmatpush1.bf16.msra.mxu0 %v2093_v1  ;;  %703 = vmatpush1.bf16.msra.mxu1 %v2093_v1 }
  0x3a   : > { %603 = vmatprep.subr.bf16.mxu0 %v2094_v3  ;;  %704 = vmatprep.subr.bf16.mxu1 %v2094_v3 }
  0x3b   : > { %457 = vmatprep.mubr.bf16.mxu0 %v2179_v2  ;;  %542 = vmatprep.mubr.bf16.mxu1 %v2179_v2 }
  0x3d   : > { %604 = vmatpush1.bf16.msra.mxu0 %v2278_v4  ;;  %705 = vmatpush1.bf16.msra.mxu1 %v2278_v4 }
  0x3e   : > { %605 = vmatprep.subr.bf16.mxu0 %v2097_v5  ;;  %706 = vmatprep.subr.bf16.mxu1 %v2097_v5 }
  0x40   : > { %458 = vmatmul.mubr.bf16.gmra.mxu0 %v332_v27  ;;  %543 = vmatmul.mubr.bf16.gmra.mxu1 %v497_v28  ;;  %v793_v28 = vlaneseq }
  0x41   : > { %606 = vmatpush1.bf16.msra.mxu0 %v2288_v6  ;;  %707 = vmatpush1.bf16.msra.mxu1 %v2288_v6 }
  0x42   : > { %607 = vmatprep.subr.bf16.mxu0 %v2293_v7  ;;  %708 = vmatprep.subr.bf16.mxu1 %v2293_v7 }
  0x43   : > { %467 = vmatprep.mubr.bf16.mxu0 %v2179_v2  ;;  %552 = vmatprep.mubr.bf16.mxu1 %v2179_v2 }
  0x45   : > { %608 = vmatpush1.bf16.msra.mxu0 %v2300_v8  ;;  %709 = vmatpush1.bf16.msra.mxu1 %v2300_v8 }
  0x46   : > { %609 = vmatprep.subr.bf16.mxu0 %v2307_v9  ;;  %710 = vmatprep.subr.bf16.mxu1 %v2307_v9 }
  0x48   : > { %468 = vmatmul.mubr.bf16.gmra.mxu0 %v333_v33  ;;  %553 = vmatmul.mubr.bf16.gmra.mxu1 %v498_v34  ;;  %v794_v33 = vshrl.u32 %v793_v28, 7 }
  0x49   : > { %610 = vmatpush1.bf16.msra.mxu0 %v2314_v10  ;;  %711 = vmatpush1.bf16.msra.mxu1 %v2314_v10 }
  0x4a   : > { %611 = vmatprep.subr.bf16.mxu0 %v2321_v11  ;;  %712 = vmatprep.subr.bf16.mxu1 %v2321_v11  ;;  %v799_v44 = vsub.s32 1, %v794_v33 }
  0x4b   : > { %477 = vmatprep.mubr.bf16.mxu0 %v2179_v2  ;;  %562 = vmatprep.mubr.bf16.mxu1 %v2179_v2 }
  0x4c   : > { %v2479_v53 = vrot.slane %v791_v43, %v799_v44 }
  0x4d   : > { %612 = vmatpush1.bf16.msra.mxu0 %v2328_v12  ;;  %713 = vmatpush1.bf16.msra.mxu1 %v2328_v12 }
  0x4e   : > { %613 = vmatprep.subr.bf16.mxu0 %v2335_v13  ;;  %714 = vmatprep.subr.bf16.mxu1 %v2335_v13 }
  0x50   : > { %478 = vmatmul.mubr.bf16.gmra.mxu0 %v334_v39  ;;  %563 = vmatmul.mubr.bf16.gmra.mxu1 %v499_v40  ;;  %v795_v40 = vsub.s32 0, %v794_v33 }
  0x51   : > { %614 = vmatpush1.bf16.msra.mxu0 %v2342_v14  ;;  %715 = vmatpush1.bf16.msra.mxu1 %v2342_v14 }
  0x52   : > { %615 = vmatprep.subr.bf16.mxu0 %v2349_v15  ;;  %716 = vmatprep.subr.bf16.mxu1 %v2349_v15 }
  0x53   : > { %633 = vmatprep.mubr.bf16.mxu0 %v2179_v2  ;;  %734 = vmatprep.mubr.bf16.mxu1 %v2179_v2 }
  0x55   : > { %616 = vmatpush1.bf16.msra.mxu0 %v2354_v16  ;;  %717 = vmatpush1.bf16.msra.mxu1 %v2354_v16 }
  0x58   : > { %634 = vmatmul.mubr.bf16.vlgmr.msra.gmra.mxu0 %v597_v45  ;;  %735 = vmatmul.mubr.bf16.vlgmr.msra.gmra.mxu1 %v698_v46 }
  0x59   : > { %643 = vmatprep.mubr.bf16.mxu0 %v2179_v2  ;;  %744 = vmatprep.mubr.bf16.mxu1 %v2179_v2 }
  0x60   : > { %644 = vmatmul.mubr.bf16.gmra.mxu0 %v598_v51  ;;  %745 = vmatmul.mubr.bf16.gmra.mxu1 %v699_v52  ;;  %v2477_v52 = vrot.slane %v791_v43, %v795_v40 }
  0x61   : > { %653 = vmatprep.mubr.bf16.mxu0 %v2179_v2  ;;  %754 = vmatprep.mubr.bf16.mxu1 %v2179_v2 }
  0x68   : > { %654 = vmatmul.mubr.bf16.gmra.mxu0 %v599_v57  ;;  %755 = vmatmul.mubr.bf16.gmra.mxu1 %v700_v58 }
  0x69   : > { %663 = vmatprep.mubr.bf16.mxu0 %v2179_v2  ;;  %764 = vmatprep.mubr.bf16.mxu1 %v2179_v2 }
  0x70   : > { %664 = vmatmul.mubr.bf16.gmra.mxu0 %v600_v63  ;;  %765 = vmatmul.mubr.bf16.gmra.mxu1 %v701_v0 }
  0xf8   : > { %v449_v1 = vpop.f32.mrf.mxu0  ;;  %v534_v3 = vpop.f32.mrf.mxu1 }
  0xf9   : > { %v573_v36 = vmax.f32 %v449_v1, %v534_v3 }
  0xfa   : > { %v451_v4 = vpop.f32.mrf.mxu0  ;;  %v536_v5 = vpop.f32.mrf.mxu1 }
  0xfb   : > { %v574_v6 = vmax.f32 %v451_v4, %v536_v5 }
  0xfc   : > { %v453_v7 = vpop.f32.mrf.mxu0  ;;  %v538_v8 = vpop.f32.mrf.mxu1 }
  0xfd   : > { %v575_v45 = vmax.f32 %v453_v7, %v538_v8 }
  0xfe   : > { %v455_v9 = vpop.f32.mrf.mxu0  ;;  %v540_v10 = vpop.f32.mrf.mxu1 }
  0xff   : > { %v576_v49 = vmax.f32 %v455_v9, %v540_v10 }
 0x100   : > { %v459_v11 = vpop.f32.mrf.mxu0  ;;  %v544_v12 = vpop.f32.mrf.mxu1 }
 0x101   : > { %v577_v56 = vmax.f32 %v459_v11, %v544_v12 }
 0x102   : > { %v2432_v13 = vpop.f32.mrf.mxu0  ;;  %v2434_v2 = vpop.f32.mrf.mxu1 }
 0x104   : > { %v2436_v14 = vpop.f32.mrf.mxu0  ;;  %v548_v15 = vpop.f32.mrf.mxu1 }
 0x105   : > { %v579_v5 = vmax.f32 %v2436_v14, %v548_v15 }
 0x106   : > { %v2438_v16 = vpop.f32.mrf.mxu0  ;;  %v2440_v17 = vpop.f32.mrf.mxu1 }
 0x108   : > { %v2442_v18 = vpop.f32.mrf.mxu0  ;;  %v2444_v19 = vpop.f32.mrf.mxu1 }
 0x10a   : > { %v2446_v20 = vpop.f32.mrf.mxu0  ;;  %v2448_v21 = vpop.f32.mrf.mxu1 }
 0x10c   : > { %v2450_v22 = vpop.f32.mrf.mxu0  ;;  %v2452_v23 = vpop.f32.mrf.mxu1 }
 0x10d   : > { %v583_v44 = vmax.f32 %v2450_v22, %v2452_v23 }
 0x10e   : > { %v2454_v24 = vpop.f32.mrf.mxu0  ;;  %v2456_v25 = vpop.f32.mrf.mxu1 }
 0x110   : > { %v2458_v26 = vpop.f32.mrf.mxu0  ;;  %v2460_v27 = vpop.f32.mrf.mxu1 }
 0x112   : > { %v2462_v29 = vpop.f32.mrf.mxu0  ;;  %v2464_v30 = vpop.f32.mrf.mxu1 }
 0x113   : > { %v586_v22 = vmax.f32 %v2462_v29, %v2464_v30 }
 0x114   : > { %v2466_v31 = vpop.f32.mrf.mxu0  ;;  %v2468_v32 = vpop.f32.mrf.mxu1 }
 0x116   : > { %v2470_v34 = vpop.f32.mrf.mxu0  ;;  %v2472_v35 = vpop.f32.mrf.mxu1 }
 0x118   : > { %v635_v37 = vpop.f32.mrf.mxu0  ;;  %v736_v38 = vpop.f32.mrf.mxu1 }
 0x119   : > { %v674_v39 = vmax.f32 %v573_v36, %v635_v37  ;;  %v581_v37 = vmax.f32 %v2442_v18, %v2444_v19 }
 0x11a   : > { %v637_v41 = vpop.f32.mrf.mxu0  ;;  %v738_v42 = vpop.f32.mrf.mxu1 }
 0x11b   : > { %v675_v46 = vmax.f32 %v574_v6, %v637_v41  ;;  %v775_v50 = vmax.f32 %v674_v39, %v736_v38 }
 0x11c   : > { %v639_v47 = vpop.f32.mrf.mxu0  ;;  %v740_v48 = vpop.f32.mrf.mxu1 }
 0x11d   : > { %v676_v51 = vmax.f32 %v575_v45, %v639_v47  ;;  %v776_v57 = vmax.f32 %v675_v46, %v738_v42  ;;  %v803_v0 = vadd.f32 %v2477_v52, %v775_v50  ;;  %v585_v50 = vmax.f32 %v2458_v26, %v2460_v27 }
 0x11e   : > { %v641_v54 = vpop.f32.mrf.mxu0  ;;  %v742_v55 = vpop.f32.mrf.mxu1  ;;  %v587_v26 = vmax.f32 %v2466_v31, %v2468_v32 }
 0x11f   : > { %v777_v58 = vmax.f32 %v676_v51, %v740_v48  ;;  %v677_v59 = vmax.f32 %v576_v49, %v641_v54  ;;  %v804_v6 = vadd.f32 %v2479_v53, %v776_v57  ;;  %v584_v54 = vmax.f32 %v2454_v24, %v2456_v25 }
 0x120   : > { %v645_v60 = vpop.f32.mrf.mxu0  ;;  %v746_v61 = vpop.f32.mrf.mxu1 }
 0x121   : > { %v778_v62 = vmax.f32 %v677_v59, %v742_v55  ;;  %v678_v63 = vmax.f32 %v577_v56, %v645_v60  ;;  %v805_v1 = vadd.f32 %v2477_v52, %v777_v58  ;;  %v582_v59 = vmax.f32 %v2446_v20, %v2448_v21 }
 0x122   : > { %v2483_v3 = vpop.f32.mrf.mxu0  ;;  %v2485_v4 = vpop.f32.mrf.mxu1  ;;  %v578_v20 = vmax.f32 %v2432_v13, %v2434_v2 }
 0x123   : > { %v806_v7 = vadd.f32 %v2479_v53, %v778_v62  ;;  %v819_v8 = vpack.c.bf16 %v805_v1, %v803_v0  ;;  %v779_v12 = vmax.f32 %v678_v63, %v746_v61  ;;  %v580_v62 = vmax.f32 %v2438_v16, %v2440_v17 }
 0x124   : > { %v649_v9 = vpop.f32.mrf.mxu0  ;;  %v750_v10 = vpop.f32.mrf.mxu1  ;;  %v588_v63 = vmax.f32 %v2470_v34, %v2472_v35  ;;  %v679_v16 = vmax.f32 %v578_v20, %v2483_v3 }
 0x125   : > { %v2490_v11 = vpack.c.bf16 %v806_v7, %v804_v6  ;;  %v680_v28 = vmax.f32 %v579_v5, %v649_v9  ;;  %827 = vxpose.xlu0.c.b16.start [1/4] (short) %v819_v8, 128  ;;  %v807_v39 = vadd.f32 %v2477_v52, %v779_v12 }
 0x126   : > { %v651_v33 = vpop.f32.mrf.mxu0  ;;  %v2492_v36 = vpop.f32.mrf.mxu1 }
 0x127   : > { %v781_v38 = vmax.f32 %v680_v28, %v750_v10  ;;  %v681_v21 = vmax.f32 %v580_v62, %v651_v33 }
 0x128   : > { %v655_v14 = vpop.f32.mrf.mxu0  ;;  %v756_v15 = vpop.f32.mrf.mxu1 }
 0x129   : > { %v809_v40 = vadd.f32 %v2477_v52, %v781_v38  ;;  %v682_v41 = vmax.f32 %v581_v37, %v655_v14  ;;  %v782_v12 = vmax.f32 %v681_v21, %v2492_v36  ;;  %v780_v37 = vmax.f32 %v679_v16, %v2485_v4 }
 0x12a   : > { %v657_v42 = vpop.f32.mrf.mxu0  ;;  %v758_v43 = vpop.f32.mrf.mxu1 }
 0x12b   : > { %v820_v45 = vpack.c.bf16 %v809_v40, %v807_v39  ;;  %v783_v48 = vmax.f32 %v682_v41, %v756_v15  ;;  %v683_v0 = vmax.f32 %v582_v59, %v657_v42  ;;  %v810_v14 = vadd.f32 %v2479_v53, %v782_v12 }
 0x12c   : > { %v659_v46 = vpop.f32.mrf.mxu0  ;;  %v760_v47 = vpop.f32.mrf.mxu1 }
 0x12d   : > { %v684_v49 = vmax.f32 %v583_v44, %v659_v46  ;;  %828 = vxpose.xlu0.c.b16.cont [2/4] (short) %v820_v45, 128  ;;  %v811_v23 = vadd.f32 %v2477_v52, %v783_v48  ;;  %v784_v9 = vmax.f32 %v683_v0, %v758_v43 }
 0x12e   : > { %v661_v18 = vpop.f32.mrf.mxu0  ;;  %v762_v19 = vpop.f32.mrf.mxu1 }
 0x12f   : > { %v785_v51 = vmax.f32 %v684_v49, %v760_v47  ;;  %v685_v27 = vmax.f32 %v584_v54, %v661_v18  ;;  %v812_v3 = vadd.f32 %v2479_v53, %v784_v9 }
 0x130   : > { %v665_v55 = vpop.f32.mrf.mxu0  ;;  %v766_v56 = vpop.f32.mrf.mxu1 }
 0x131   : > { %v813_v57 = vadd.f32 %v2477_v52, %v785_v51  ;;  %v686_v58 = vmax.f32 %v585_v50, %v665_v55  ;;  %v786_v32 = vmax.f32 %v685_v27, %v762_v19 }
 0x132   : > { %v667_v60 = vpop.f32.mrf.mxu0  ;;  %v768_v61 = vpop.f32.mrf.mxu1 }
 0x133   : > { %v687_v24 = vmax.f32 %v586_v22, %v667_v60  ;;  %v821_v25 = vpack.c.bf16 %v813_v57, %v811_v23  ;;  %v787_v1 = vmax.f32 %v686_v58, %v766_v56  ;;  %v814_v28 = vadd.f32 %v2479_v53, %v786_v32 }
 0x134   : > { %v669_v29 = vpop.f32.mrf.mxu0  ;;  %v770_v30 = vpop.f32.mrf.mxu1 }
 0x135   : > { %v688_v5 = vmax.f32 %v587_v26, %v669_v29  ;;  %829 = vxpose.xlu0.c.b16.cont [3/4] (short) %v821_v25, 128  ;;  %v788_v6 = vmax.f32 %v687_v24, %v768_v61  ;;  %v815_v10 = vadd.f32 %v2477_v52, %v787_v1  ;;  %v825_v15 = vpack.c.bf16 %v814_v28, %v812_v3 }
 0x136   : > { %v671_v31 = vpop.f32.mrf.mxu0  ;;  %v772_v17 = vpop.f32.mrf.mxu1 }
 0x137   : > { %v789_v7 = vmax.f32 %v688_v5, %v770_v30  ;;  %v689_v8 = vmax.f32 %v588_v63, %v671_v31  ;;  %v816_v13 = vadd.f32 %v2479_v53, %v788_v6 }
 0x139   : > { %v817_v34 = vadd.f32 %v2477_v52, %v789_v7  ;;  %v790_v35 = vmax.f32 %v689_v8, %v772_v17  ;;  %v808_v52 = vadd.f32 %v2479_v53, %v780_v37 }
 0x13b   : > { %v818_v2 = vadd.f32 %v2479_v53, %v790_v35  ;;  %v822_v33 = vpack.c.bf16 %v817_v34, %v815_v10  ;;  %v824_v36 = vpack.c.bf16 %v810_v14, %v808_v52 }
 0x13d   : > { %v826_v38 = vpack.c.bf16 %v818_v2, %v816_v13  ;;  %830 = vxpose.xlu0.c.b16.end [4/4] (short) %v822_v33, 128 }
 0x13f   : > { %1906 = vmatprep.subr.bf16.mxu0 %v826_v38  ;;  %2026 = vmatprep.subr.bf16.mxu1 %v826_v38 }
 0x140   : > { %1907 = vmatpush3.bf16.msra.mxu0 %v826_v38  ;;  %2030 = vmatpush3.bf16.msra.mxu1 %v826_v38 }
 0x141   : > { %1908 = vmatprep.subr.bf16.mxu0 %v825_v15  ;;  %2027 = vmatprep.subr.bf16.mxu1 %v825_v15 }
 0x144   : > { %1909 = vmatpush3.bf16.msra.mxu0 %v825_v15  ;;  %2031 = vmatpush3.bf16.msra.mxu1 %v825_v15 }
 0x145   : > { %1910 = vmatprep.subr.bf16.mxu0 %v824_v36  ;;  %2028 = vmatprep.subr.bf16.mxu1 %v824_v36 }
 0x148   : > { %1911 = vmatpush3.bf16.msra.mxu0 %v824_v36  ;;  %2032 = vmatpush3.bf16.msra.mxu1 %v824_v36 }
 0x149   : > { %1912 = vmatprep.subr.bf16.mxu0 %v2490_v11  ;;  %2029 = vmatprep.subr.bf16.mxu1 %v2490_v11 }
 0x14c   : > { %1913 = vmatpush3.bf16.msra.mxu0 %v2490_v11  ;;  %2033 = vmatpush3.bf16.msra.mxu1 %v2490_v11 }
 0x193   : > { %v835_v4 = vpop.trf.xlu0 }
 0x194   : > { %1914 = vmatprep.mubr.msk.bf16.mxu0 %vm843_vm0, %v835_v4 }
 0x197   : > { %v836_v53 = vpop.trf.xlu0 }
 0x198   : > { %1915 = vmatmul.mubr.msk.bf16.vlgmr.msra.gmra.mxu0 %vm843_vm0, %v836_v53 }
 0x19b   : > { %v837_v39 = vpop.trf.xlu0 }
 0x19c   : > { %1918 = vmatprep.mubr.msk.bf16.mxu0 %vm843_vm0, %v837_v39 }
 0x19f   : > { %v838_v40 = vpop.trf.xlu0 }
 0x1a0   : > { %1919 = vmatmul.mubr.msk.bf16.gmra.mxu0 %vm843_vm0, %v838_v40 }
 0x1a3   : > { %v839_v41 = vpop.trf.xlu0 }
 0x1a4   : > { %1922 = vmatprep.mubr.msk.bf16.mxu1 %vm843_vm0, %v839_v41 }
 0x1a7   : > { %v840_v42 = vpop.trf.xlu0 }
 0x1a8   : > { %1923 = vmatmul.mubr.msk.bf16.vlgmr.msra.gmra.mxu1 %vm843_vm0, %v840_v42 }
 0x1ab   : > { %v841_v11 = vpop.trf.xlu0 }
 0x1ac   : > { %1926 = vmatprep.mubr.msk.bf16.mxu1 %vm843_vm0, %v841_v11 }
 0x1af   : > { %v842_v43 = vpop.trf.xlu0 }
 0x1b0   : > { %1927 = vmatmul.mubr.msk.bf16.gmra.mxu1 %vm843_vm0, %v842_v43 }
 0x258   : > { %v1916_v44 = vpop.f32.mrf.mxu0 }
 0x25a   : > { %v902_v45 = vpop.f32.mrf.mxu0 }
 0x25c   : > { %v1917_v46 = vpop.f32.mrf.mxu0 }
 0x25d   : > { %v1807_v47 = vpack.c.bf16 %v1917_v46, %v1916_v44 }
 0x25e   : > { %v905_v48 = vpop.f32.mrf.mxu0 }
 0x25f   : > { %1839 = vst [vmem:[#allocation2 + $0x8] sm:$0xff] %v1807_v47   ;;  %v1802_v49 = vpack.c.bf16 %v905_v48, %v902_v45 }
 0x260   : > { %v1920_v18 = vpop.f32.mrf.mxu0 }
 0x261   : > { %1803 = vst [vmem:[#allocation2] sm:$0xff] %v1802_v49  }
 0x262   : > { %v918_v19 = vpop.f32.mrf.mxu0 }
 0x264   : > { %v1921_v50 = vpop.f32.mrf.mxu0 }
 0x265   : > { %v1817_v51 = vpack.c.bf16 %v1921_v50, %v1920_v18 }
 0x266   : > { %v921_v54 = vpop.f32.mrf.mxu0 }
 0x267   : > { %1841 = vst [vmem:[#allocation2 + $0x18] sm:$0xff] %v1817_v51   ;;  %v1812_v55 = vpack.c.bf16 %v921_v54, %v918_v19 }
 0x268   : > { %v1924_v56 = vpop.f32.mrf.mxu1 }
 0x269   : > { %1840 = vst [vmem:[#allocation2 + $0x10] sm:$0xff] %v1812_v55  }
 0x26a   : > { %v934_v22 = vpop.f32.mrf.mxu1 }
 0x26c   : > { %v1925_v23 = vpop.f32.mrf.mxu1 }
 0x26d   : > { %v1827_v57 = vpack.c.bf16 %v1925_v23, %v1924_v56 }
 0x26e   : > { %v937_v58 = vpop.f32.mrf.mxu1 }
 0x26f   : > { %1843 = vst [vmem:[#allocation2 + $0x28] sm:$0xff] %v1827_v57   ;;  %v1822_v59 = vpack.c.bf16 %v937_v58, %v934_v22 }
 0x270   : > { %v1928_v60 = vpop.f32.mrf.mxu1 }
 0x271   : > { %1842 = vst [vmem:[#allocation2 + $0x20] sm:$0xff] %v1822_v59  }
 0x272   : > { %v950_v61 = vpop.f32.mrf.mxu1 }
 0x274   : > { %v1929_v26 = vpop.f32.mrf.mxu1 }
 0x275   : > { %v1837_v27 = vpack.c.bf16 %v1929_v26, %v1928_v60 }
 0x276   : > { %v953_v24 = vpop.f32.mrf.mxu1 }
 0x277   : > { %1845 = vst [vmem:[#allocation2 + $0x38] sm:$0xff] %v1837_v27   ;;  %v1832_v25 = vpack.c.bf16 %v953_v24, %v950_v61 }
 0x279   : > { %1844 = vst [vmem:[#allocation2 + $0x30] sm:$0xff] %v1832_v25  }
 0x27a PF: > { %v2115_v62 = vld [vmem:[%s2713_s3 + $0x38] sm:$0xff]   ;;  %v2116_v29 = vld [vmem:[%s2713_s3 + $0x30] sm:$0xff]   ;;  %s1753_s10 = sshll.u32 %s2161_s24, 7  ;;  %v2117_v30 = vld [vmem:[%s2713_s3 + $0x28] sm:$0xff]  }
 0x27b   : > { %1930 = vmatprep.subr.bf16.mxu0 %v2115_v62  ;;  %s2552_s14 = scalar_lea.vmem %s2256_s13, %s1753_s10  ;;  %v2118_v63 = vld [vmem:[%s2713_s3 + $0x20] sm:$0xff]   ;;  %v2119_v20 = vld [vmem:[%s2713_s3 + $0x18] sm:$0xff]   ;;  %v2120_v32 = vld [vmem:[%s2713_s3 + $0x10] sm:$0xff]  }
 0x27c   : > { %1931 = vmatpush3.bf16.msra.mxu0 %v2115_v62  ;;  %v2558_v0 = vld [vmem:[%s2552_s14] sm:$0xff]  ;;  %v2561_v1 = vld [vmem:[%s2552_s14 + $0x8] sm:$0xff]  ;;  %v2127_v17 = vld [vmem:[#allocation2 + $0x18] sm:$0xff]  }
 0x27d   : > { %1932 = vmatprep.subr.bf16.mxu0 %v2116_v29  ;;  %v1063_v5 = vpack.c.bf16 %v2561_v1, %v2558_v0  ;;  %v2121_v6 = vld [vmem:[%s2713_s3 + $0x8] sm:$0xff]   ;;  %v2126_v8 = vld [vmem:[#allocation2 + $0x20] sm:$0xff]   ;;  %v2578_v9 = vld [vmem:[%s2552_s14 + $0x10] sm:$0xff] }
 0x27e   : > { %v2123_v21 = vld [vmem:[#allocation2 + $0x38] sm:$0xff]   ;;  %v2125_v7 = vld [vmem:[#allocation2 + $0x28] sm:$0xff]   ;;  %v2122_v16 = vld [vmem:[%s2713_s3] sm:$0xff]  }
 0x27f   : > { %1946 = vmatprep.mubr.bf16.mxu0 %v1063_v5  ;;  %1962 = vmatprep.subr.bf16.mxu1 %v2123_v21  ;;  %v2581_v10 = vld [vmem:[%s2552_s14 + $0x18] sm:$0xff]  ;;  %v2584_v34 = vld [vmem:[%s2552_s14 + $0x20] sm:$0xff]  ;;  %v2587_v35 = vld [vmem:[%s2552_s14 + $0x28] sm:$0xff] }
 0x280   : > { %1933 = vmatpush3.bf16.msra.mxu0 %v2116_v29  ;;  %v2124_v31 = vld [vmem:[#allocation2 + $0x30] sm:$0xff]   ;;  %1963 = vmatpush3.bf16.msra.mxu1 %v2123_v21  ;;  %v1064_v12 = vpack.c.bf16 %v2581_v10, %v2578_v9  ;;  %v1065_v28 = vpack.c.bf16 %v2587_v35, %v2584_v34  ;;  %v2597_v2 = vld [vmem:[%s2552_s14 + $0x38] sm:$0xff]  ;;  %v2600_v33 = vld [vmem:[%s2552_s14 + $0x40] sm:$0xff] }
 0x281   : > { %1934 = vmatprep.subr.bf16.mxu0 %v2117_v30  ;;  %1964 = vmatprep.subr.bf16.mxu1 %v2124_v31  ;;  %v2594_v13 = vld [vmem:[%s2552_s14 + $0x30] sm:$0xff]  ;;  %v2603_v37 = vld [vmem:[%s2552_s14 + $0x48] sm:$0xff]  ;;  %v2613_v15 = vld [vmem:[%s2552_s14 + $0x58] sm:$0xff] }
 0x282   : > { %v1066_v3 = vpack.c.bf16 %v2597_v2, %v2594_v13  ;;  %v1067_v38 = vpack.c.bf16 %v2603_v37, %v2600_v33  ;;  %v2610_v14 = vld [vmem:[%s2552_s14 + $0x50] sm:$0xff]  ;;  %v2616_v52 = vld [vmem:[%s2552_s14 + $0x60] sm:$0xff]  ;;  %v2619_v36 = vld [vmem:[%s2552_s14 + $0x68] sm:$0xff] }
 0x283   : > { %v1068_v4 = vpack.c.bf16 %v2613_v15, %v2610_v14  ;;  %v1069_v53 = vpack.c.bf16 %v2619_v36, %v2616_v52  ;;  %v2626_v39 = vld [vmem:[%s2552_s14 + $0x70] sm:$0xff]  ;;  %v2629_v40 = vld [vmem:[%s2552_s14 + $0x78] sm:$0xff]  ;;  %v2129_v11 = vld [vmem:[#allocation2 + $0x8] sm:$0xff]  }
 0x284   : > { %1935 = vmatpush3.bf16.msra.mxu0 %v2117_v30  ;;  %1965 = vmatpush3.bf16.msra.mxu1 %v2124_v31  ;;  %v1070_v41 = vpack.c.bf16 %v2629_v40, %v2626_v39  ;;  %v2128_v42 = vld [vmem:[#allocation2 + $0x10] sm:$0xff]   ;;  %v2130_v43 = vld [vmem:[#allocation2] sm:$0xff]   ;;  %v2131_v44 = vld [vmem:[%s2715_s5 + $0x38] sm:$0xff]  }
 0x285   : > { %1936 = vmatprep.subr.bf16.mxu0 %v2118_v63  ;;  %1966 = vmatprep.subr.bf16.mxu1 %v2125_v7  ;;  %v2132_v45 = vld [vmem:[%s2715_s5 + $0x30] sm:$0xff]   ;;  %v2133_v46 = vld [vmem:[%s2715_s5 + $0x28] sm:$0xff]   ;;  %v2134_v47 = vld [vmem:[%s2715_s5 + $0x20] sm:$0xff]  }
 0x286   : > { %v2135_v48 = vld [vmem:[%s2715_s5 + $0x18] sm:$0xff]   ;;  %v2136_v49 = vld [vmem:[%s2715_s5 + $0x10] sm:$0xff]   ;;  %v1754_v51 = vld [vmem:[%s2714_s4] ss:$0 sm:$0xff] }
 0x288   : > { %1937 = vmatpush3.bf16.msra.mxu0 %v2118_v63  ;;  %1967 = vmatpush3.bf16.msra.mxu1 %v2125_v7 }
 0x289   : > { %1938 = vmatprep.subr.bf16.mxu0 %v2119_v20  ;;  %1968 = vmatprep.subr.bf16.mxu1 %v2126_v8 }
 0x28c   : > { %1939 = vmatpush3.bf16.msra.mxu0 %v2119_v20  ;;  %1969 = vmatpush3.bf16.msra.mxu1 %v2126_v8 }
 0x28d   : > { %1940 = vmatprep.subr.bf16.mxu0 %v2120_v32  ;;  %1970 = vmatprep.subr.bf16.mxu1 %v2127_v17 }
 0x290   : > { %1941 = vmatpush3.bf16.msra.mxu0 %v2120_v32  ;;  %1971 = vmatpush3.bf16.msra.mxu1 %v2127_v17 }
 0x291   : > { %1942 = vmatprep.subr.bf16.mxu0 %v2121_v6  ;;  %1972 = vmatprep.subr.bf16.mxu1 %v2128_v42 }
 0x294   : > { %1943 = vmatpush3.bf16.msra.mxu0 %v2121_v6  ;;  %1973 = vmatpush3.bf16.msra.mxu1 %v2128_v42 }
 0x295   : > { %1944 = vmatprep.subr.bf16.mxu0 %v2122_v16  ;;  %1974 = vmatprep.subr.bf16.mxu1 %v2129_v11 }
 0x298   : > { %1945 = vmatpush3.bf16.msra.mxu0 %v2122_v16  ;;  %1975 = vmatpush3.bf16.msra.mxu1 %v2129_v11 }
 0x299   : > { %1976 = vmatprep.subr.bf16.mxu1 %v2130_v43  ;;  %1994 = vmatprep.subr.bf16.mxu0 %v2131_v44 }
 0x29b   : > { %1947 = vmatmul.mubr.bf16.vlgmr.msra.gmra.mxu0 %v1064_v12 }
 0x29c   : > { %1950 = vmatprep.mubr.bf16.mxu0 %v1065_v28  ;;  %1977 = vmatpush3.bf16.msra.mxu1 %v2130_v43  ;;  %v2137_v43 = vld [vmem:[%s2715_s5 + $0x8] sm:$0xff]  }
 0x29d   : > { %2034 = vmatprep.subr.bf16.mxu1 %v2131_v44  ;;  %1995 = vmatpush3.bf16.msra.mxu0 %v2131_v44 }
 0x29e   : > { %1996 = vmatprep.subr.bf16.mxu0 %v2132_v45 }
 0x2a1   : > { %1997 = vmatpush3.bf16.msra.mxu0 %v2132_v45 }
 0x2a2   : > { %1998 = vmatprep.subr.bf16.mxu0 %v2133_v46 }
 0x2a3   : > { %1951 = vmatmul.mubr.bf16.gmra.mxu0 %v1066_v3 }
 0x2a4   : > { %1954 = vmatprep.mubr.bf16.mxu0 %v1067_v38 }
 0x2a5   : > { %1999 = vmatpush3.bf16.msra.mxu0 %v2133_v46 }
 0x2a6   : > { %2000 = vmatprep.subr.bf16.mxu0 %v2134_v47 }
 0x2a9   : > { %2001 = vmatpush3.bf16.msra.mxu0 %v2134_v47 }
 0x2aa   : > { %2002 = vmatprep.subr.bf16.mxu0 %v2135_v48 }
 0x2ab   : > { %1955 = vmatmul.mubr.bf16.gmra.mxu0 %v1068_v4 }
 0x2ac   : > { %1958 = vmatprep.mubr.bf16.mxu0 %v1069_v53 }
 0x2ad   : > { %2003 = vmatpush3.bf16.msra.mxu0 %v2135_v48 }
 0x2ae   : > { %2004 = vmatprep.subr.bf16.mxu0 %v2136_v49 }
 0x2b1   : > { %2005 = vmatpush3.bf16.msra.mxu0 %v2136_v49 }
 0x2b2   : > { %2006 = vmatprep.subr.bf16.mxu0 %v2137_v43 }
 0x2b3   : > { %1959 = vmatmul.mubr.bf16.gmra.mxu0 %v1070_v41 }
 0x2b5   : > { %2007 = vmatpush3.bf16.msra.mxu0 %v2137_v43 }
 0x35b   : > { %v1948_v18 = vpop.f32.mrf.mxu0 }
 0x35c   : > { %v1185_v23 = vadd.f32 %v1948_v18, %v1754_v51 }
 0x35d   : > { %v1176_v19 = vpop.f32.mrf.mxu0 }
 0x35e   : > { %v1177_v56 = vadd.f32 %v1754_v51, %v1176_v19 }
 0x35f   : > { %v1949_v50 = vpop.f32.mrf.mxu0 }
 0x360   : > { %v1188_v54 = vadd.f32 %v1949_v50, %v1754_v51 }
 0x361   : > { %v1179_v55 = vpop.f32.mrf.mxu0 }
 0x362   : > { %v1180_v22 = vadd.f32 %v1754_v51, %v1179_v55  ;;  %v1240_v59 = vpack.c.bf16 %v1188_v54, %v1185_v23 }
 0x363   : > { %v1952_v57 = vpop.f32.mrf.mxu0 }
 0x364   : > { %v1239_v58 = vpack.c.bf16 %v1180_v22, %v1177_v56  ;;  %v1201_v62 = vadd.f32 %v1952_v57, %v1754_v51 }
 0x365   : > { %v1192_v60 = vpop.f32.mrf.mxu0 }
 0x366   : > { %1978 = vmatprep.mubr.bf16.mxu1 %v1239_v58  ;;  %v1193_v24 = vadd.f32 %v1754_v51, %v1192_v60 }
 0x367   : > { %v1953_v61 = vpop.f32.mrf.mxu0  ;;  %1979 = vmatmul.mubr.bf16.vlgmr.msra.gmra.mxu1 %v1240_v59 }
 0x368   : > { %2042 = vmatpush3.bf16.msra.mxu1 %v2131_v44  ;;  %v1204_v26 = vadd.f32 %v1953_v61, %v1754_v51  ;;  %v2138_v44 = vld [vmem:[%s2715_s5] sm:$0xff]  }
 0x369   : > { %v1195_v27 = vpop.f32.mrf.mxu0  ;;  %2035 = vmatprep.subr.bf16.mxu1 %v2132_v45  ;;  %2008 = vmatprep.subr.bf16.mxu0 %v2138_v44 }
 0x36a   : > { %v1196_v25 = vadd.f32 %v1754_v51, %v1195_v27  ;;  %v1242_v63 = vpack.c.bf16 %v1204_v26, %v1201_v62  ;;  %2009 = vmatpush3.bf16.msra.mxu0 %v2138_v44 }
 0x36b   : > { %v1956_v29 = vpop.f32.mrf.mxu0 }
 0x36c   : > { %v1241_v30 = vpack.c.bf16 %v1196_v25, %v1193_v24  ;;  %2043 = vmatpush3.bf16.msra.mxu1 %v2132_v45  ;;  %v1217_v7 = vadd.f32 %v1956_v29, %v1754_v51  ;;  %v1771_v29 = vld [vmem:[%s2716_s6] ss:$0 sm:$0xff] }
 0x36d   : > { %v1208_v5 = vpop.f32.mrf.mxu0  ;;  %2036 = vmatprep.subr.bf16.mxu1 %v2133_v46 }
 0x36e   : > { %1982 = vmatprep.mubr.bf16.mxu1 %v1241_v30  ;;  %v1209_v32 = vadd.f32 %v1754_v51, %v1208_v5 }
 0x36f   : > { %v1957_v20 = vpop.f32.mrf.mxu0  ;;  %1983 = vmatmul.mubr.bf16.gmra.mxu1 %v1242_v63 }
 0x370   : > { %2044 = vmatpush3.bf16.msra.mxu1 %v2133_v46  ;;  %v1220_v21 = vadd.f32 %v1957_v20, %v1754_v51 }
 0x371   : > { %v1211_v31 = vpop.f32.mrf.mxu0  ;;  %2037 = vmatprep.subr.bf16.mxu1 %v2134_v47 }
 0x372   : > { %v1212_v6 = vadd.f32 %v1754_v51, %v1211_v31  ;;  %v1244_v17 = vpack.c.bf16 %v1220_v21, %v1217_v7 }
 0x373   : > { %v1960_v8 = vpop.f32.mrf.mxu0 }
 0x374   : > { %v1243_v16 = vpack.c.bf16 %v1212_v6, %v1209_v32  ;;  %2045 = vmatpush3.bf16.msra.mxu1 %v2134_v47  ;;  %v1233_v41 = vadd.f32 %v1960_v8, %v1754_v51 }
 0x375   : > { %v1224_v12 = vpop.f32.mrf.mxu0  ;;  %2038 = vmatprep.subr.bf16.mxu1 %v2135_v48 }
 0x376   : > { %1986 = vmatprep.mubr.bf16.mxu1 %v1243_v16  ;;  %v1225_v4 = vadd.f32 %v1754_v51, %v1224_v12 }
 0x377   : > { %v1961_v28 = vpop.f32.mrf.mxu0  ;;  %1987 = vmatmul.mubr.bf16.gmra.mxu1 %v1244_v17 }
 0x378   : > { %2046 = vmatpush3.bf16.msra.mxu1 %v2135_v48  ;;  %v1236_v3 = vadd.f32 %v1961_v28, %v1754_v51 }
 0x379   : > { %v1227_v38 = vpop.f32.mrf.mxu0  ;;  %2039 = vmatprep.subr.bf16.mxu1 %v2136_v49 }
 0x37a   : > { %v1228_v53 = vadd.f32 %v1754_v51, %v1227_v38  ;;  %v1246_v11 = vpack.c.bf16 %v1236_v3, %v1233_v41 }
 0x37c   : > { %v1245_v42 = vpack.c.bf16 %v1228_v53, %v1225_v4  ;;  %2047 = vmatpush3.bf16.msra.mxu1 %v2136_v49 }
 0x37d   : > { %2040 = vmatprep.subr.bf16.mxu1 %v2137_v43 }
 0x37e   : > { %1990 = vmatprep.mubr.bf16.mxu1 %v1245_v42 }
 0x37f   : > { %1991 = vmatmul.mubr.bf16.gmra.mxu1 %v1246_v11 }
 0x380   : > { %2048 = vmatpush3.bf16.msra.mxu1 %v2137_v43 }
 0x381   : > { %2041 = vmatprep.subr.bf16.mxu1 %v2138_v44 }
 0x384   : > { %2049 = vmatpush3.bf16.msra.mxu1 %v2138_v44 }
 0x427   : > { %v1980_v45 = vpop.f32.mrf.mxu1 }
 0x429   : > { %v1345_v46 = vpop.f32.mrf.mxu1 }
 0x42b   : > { %v1981_v47 = vpop.f32.mrf.mxu1 }
 0x42c   : > { %v1409_v18 = vpack.c.bf16 %v1981_v47, %v1980_v45 }
 0x42d   : > { %v1348_v48 = vpop.f32.mrf.mxu1 }
 0x42e   : > { %v1408_v49 = vpack.c.bf16 %v1348_v48, %v1345_v46 }
 0x42f   : > { %v1984_v19 = vpop.f32.mrf.mxu1 }
 0x430   : > { %2010 = vmatprep.mubr.bf16.mxu0 %v1408_v49 }
 0x431   : > { %v1361_v50 = vpop.f32.mrf.mxu1  ;;  %2011 = vmatmul.mubr.bf16.vlgmr.msra.gmra.mxu0 %v1409_v18 }
 0x433   : > { %v1985_v51 = vpop.f32.mrf.mxu1 }
 0x434   : > { %v1411_v56 = vpack.c.bf16 %v1985_v51, %v1984_v19 }
 0x435   : > { %v1364_v54 = vpop.f32.mrf.mxu1 }
 0x436   : > { %v1410_v55 = vpack.c.bf16 %v1364_v54, %v1361_v50 }
 0x437   : > { %v1988_v22 = vpop.f32.mrf.mxu1 }
 0x438   : > { %2014 = vmatprep.mubr.bf16.mxu0 %v1410_v55 }
 0x439   : > { %v1377_v23 = vpop.f32.mrf.mxu1  ;;  %2015 = vmatmul.mubr.bf16.gmra.mxu0 %v1411_v56 }
 0x43b   : > { %v1989_v57 = vpop.f32.mrf.mxu1 }
 0x43c   : > { %v1413_v60 = vpack.c.bf16 %v1989_v57, %v1988_v22 }
 0x43d   : > { %v1380_v58 = vpop.f32.mrf.mxu1 }
 0x43e   : > { %v1412_v59 = vpack.c.bf16 %v1380_v58, %v1377_v23 }
 0x43f   : > { %v1992_v61 = vpop.f32.mrf.mxu1 }
 0x440   : > { %2018 = vmatprep.mubr.bf16.mxu1 %v1412_v59 }
 0x441   : > { %v1393_v26 = vpop.f32.mrf.mxu1  ;;  %2019 = vmatmul.mubr.bf16.vlgmr.msra.gmra.mxu1 %v1413_v60 }
 0x443   : > { %v1993_v27 = vpop.f32.mrf.mxu1 }
 0x444   : > { %v1415_v62 = vpack.c.bf16 %v1993_v27, %v1992_v61 }
 0x445   : > { %v1396_v24 = vpop.f32.mrf.mxu1 }
 0x446   : > { %v1414_v25 = vpack.c.bf16 %v1396_v24, %v1393_v26 }
 0x448   : > { %2022 = vmatprep.mubr.bf16.mxu1 %v1414_v25 }
 0x449   : > { %2023 = vmatmul.mubr.bf16.gmra.mxu1 %v1415_v62 }
 0x4f1   : > { %v2012_v30 = vpop.f32.mrf.mxu0 }
 0x4f2   : > { %v1530_v63 = vadd.f32 %v2012_v30, %v1771_v29 }
 0x4f3   : > { %v1521_v5 = vpop.f32.mrf.mxu0 }
 0x4f4   : > { %v1586_v20 = vadd.f32 %v1530_v63, %v2578_v9  ;;  %v1522_v21 = vadd.f32 %v1771_v29, %v1521_v5 }
 0x4f5   : > { %v2013_v31 = vpop.f32.mrf.mxu0 }
 0x4f6   : > { %1602 = vst [vmem:[%s2261_s18 + $0x10] sm:$0xff] %v1586_v20  ;;  %v1584_v32 = vadd.f32 %v1522_v21, %v2558_v0  ;;  %v1533_v6 = vadd.f32 %v2013_v31, %v1771_v29 }
 0x4f7   : > { %v1524_v7 = vpop.f32.mrf.mxu0 }
 0x4f8   : > { %1600 = vst [vmem:[%s2261_s18] sm:$0xff] %v1584_v32  ;;  %v1587_v8 = vadd.f32 %v1533_v6, %v2581_v10  ;;  %v1525_v16 = vadd.f32 %v1771_v29, %v1524_v7 }
 0x4f9   : > { %v2016_v17 = vpop.f32.mrf.mxu0 }
 0x4fa   : > { %1603 = vst [vmem:[%s2261_s18 + $0x18] sm:$0xff] %v1587_v8  ;;  %v1585_v12 = vadd.f32 %v1525_v16, %v2561_v1  ;;  %v1546_v28 = vadd.f32 %v2016_v17, %v1771_v29 }
 0x4fb   : > { %v1537_v9 = vpop.f32.mrf.mxu0 }
 0x4fc   : > { %1601 = vst [vmem:[%s2261_s18 + $0x8] sm:$0xff] %v1585_v12  ;;  %v1590_v3 = vadd.f32 %v1546_v28, %v2594_v13  ;;  %v1538_v38 = vadd.f32 %v1771_v29, %v1537_v9 }
 0x4fd   : > { %v2017_v0 = vpop.f32.mrf.mxu0 }
 0x4fe   : > { %1606 = vst [vmem:[%s2261_s18 + $0x30] sm:$0xff] %v1590_v3  ;;  %v1588_v4 = vadd.f32 %v1538_v38, %v2584_v34  ;;  %v1549_v53 = vadd.f32 %v2017_v0, %v1771_v29 }
 0x4ff   : > { %v1540_v10 = vpop.f32.mrf.mxu0 }
 0x500   : > { %1604 = vst [vmem:[%s2261_s18 + $0x20] sm:$0xff] %v1588_v4  ;;  %v1591_v41 = vadd.f32 %v1549_v53, %v2597_v2  ;;  %v1541_v42 = vadd.f32 %v1771_v29, %v1540_v10 }
 0x501   : > { %v2020_v1 = vpop.f32.mrf.mxu1 }
 0x502   : > { %1607 = vst [vmem:[%s2261_s18 + $0x38] sm:$0xff] %v1591_v41  ;;  %v1589_v11 = vadd.f32 %v1541_v42, %v2587_v35  ;;  %v1562_v43 = vadd.f32 %v2020_v1, %v1771_v29 }
 0x503   : > { %v1553_v13 = vpop.f32.mrf.mxu1 }
 0x504   : > { %1605 = vst [vmem:[%s2261_s18 + $0x28] sm:$0xff] %v1589_v11  ;;  %v1594_v44 = vadd.f32 %v1562_v43, %v2610_v14  ;;  %v1554_v45 = vadd.f32 %v1771_v29, %v1553_v13 }
 0x505   : > { %v2021_v34 = vpop.f32.mrf.mxu1 }
 0x506   : > { %1610 = vst [vmem:[%s2261_s18 + $0x50] sm:$0xff] %v1594_v44  ;;  %v1592_v46 = vadd.f32 %v1554_v45, %v2600_v33  ;;  %v1565_v47 = vadd.f32 %v2021_v34, %v1771_v29 }
 0x507   : > { %v1556_v2 = vpop.f32.mrf.mxu1 }
 0x508   : > { %1608 = vst [vmem:[%s2261_s18 + $0x40] sm:$0xff] %v1592_v46  ;;  %v1595_v48 = vadd.f32 %v1565_v47, %v2613_v15  ;;  %v1557_v49 = vadd.f32 %v1771_v29, %v1556_v2 }
 0x509   : > { %v2024_v35 = vpop.f32.mrf.mxu1 }
 0x50a   : > { %1611 = vst [vmem:[%s2261_s18 + $0x58] sm:$0xff] %v1595_v48  ;;  %v1593_v18 = vadd.f32 %v1557_v49, %v2603_v37  ;;  %v1578_v14 = vadd.f32 %v2024_v35, %v1771_v29 }
 0x50b   : > { %v1569_v19 = vpop.f32.mrf.mxu1 }
 0x50c   : > { %1609 = vst [vmem:[%s2261_s18 + $0x48] sm:$0xff] %v1593_v18  ;;  %v1598_v50 = vadd.f32 %v1578_v14, %v2626_v39  ;;  %v1570_v51 = vadd.f32 %v1771_v29, %v1569_v19 }
 0x50d   : > { %v2025_v33 = vpop.f32.mrf.mxu1 }
 0x50e   : > { %1614 = vst [vmem:[%s2261_s18 + $0x70] sm:$0xff] %v1598_v50  ;;  %v1596_v54 = vadd.f32 %v1570_v51, %v2616_v52  ;;  %v1581_v55 = vadd.f32 %v2025_v33, %v1771_v29 }
 0x50f   : > { %v1572_v56 = vpop.f32.mrf.mxu1 }
 0x510   : > { %1612 = vst [vmem:[%s2261_s18 + $0x60] sm:$0xff] %v1596_v54  ;;  %v1599_v15 = vadd.f32 %v1581_v55, %v2629_v40  ;;  %v1573_v22 = vadd.f32 %v1771_v29, %v1572_v56 }
 0x512   : > { %1615 = vst [vmem:[%s2261_s18 + $0x78] sm:$0xff] %v1599_v15  ;;  %v1597_v37 = vadd.f32 %v1573_v22, %v2619_v36 }
 0x514   : > { %1613 = vst [vmem:[%s2261_s18 + $0x68] sm:$0xff] %v1597_v37 }
 0x515 PF: > { %s17_s28 = sadd.s32 1, %s2177_s28   ;;  %s2718_s24 = smov %s2169_s26 }
 0x516   : > { %p14_p8 = scmp.ge.s32.totalorder %s17_s28, 6   ;;  %s2719_s25 = smov %s2173_s27 }
 0x517   : > { %s2720_s26 = smov %s2723_s29  ;;  %s2721_s27 = smov %s2727_s30 }
 0x518   :  { %16 = sbr.rel (!%p14_p8) target bundleno = 3 (0x3), region = 83 }

</bundles_post_ra>
